<compile_context>
chip_gen: v7x
topology: tpu7x:2x2x1
jax: 0.10.0
libtpu: 0.0.40
codegen_flags: <defaults>
</compile_context>

<pallas_src>
import jax
import jax.numpy as jnp
from jax.experimental import pallas as pl
from jax.experimental.pallas import tpu as pltpu

_FEAT = 64     # encoder feature width (classifier is Linear(64, NC))
_LANE = 128    # TPU lane width


def _round_up(v, m):
    return (v + m - 1) // m * m


def _pick_tile(total, target, align):
    """Largest multiple of `align` that divides `total` and is <= target."""
    best = align
    t = align
    limit = min(target, total)
    while t <= limit:
        if total % t == 0:
            best = t
        t += align
    return best


# --------------------------------------------------------------------------
# Kernel: streamed GEMM   out[m] = sum_k x[m,k] @ W[k] ,  bias folded in init.
# --------------------------------------------------------------------------
def _semisup_kernel(x_ref, w_ref, b_ref, out_ref):
    """x_ref: [tm, tk] bf16, w_ref: [tk, 128] bf16, b_ref: [1, 128] f32,
    out_ref: [tm, 128] f32 (resident across the k axis)."""
    k = pl.program_id(1)

    @pl.when(k == 0)
    def _init():
        # Fold the (classifier-composed) bias into the accumulator init.
        out_ref[...] = jnp.broadcast_to(b_ref[...], out_ref.shape)

    out_ref[...] += jnp.dot(
        x_ref[...], w_ref[...], preferred_element_type=jnp.float32
    )


# --------------------------------------------------------------------------
# One-time parameter preparation (hoisted out of the per-call forward path).
# --------------------------------------------------------------------------
def prepare_params(params):
    """Fold the two linear encoder branches and the classifier into a single
    padded bf16 weight + f32 bias.  Call once; reuse across forward calls."""
    w_enc = 0.5 * (params["w_time"] + params["w_freq"])        # [D, 64] f32
    b_enc = 0.5 * (params["b_time"] + params["b_freq"])        # [1, 64] f32
    wc, bc = params["w_cls"], params["b_cls"]                  # [64, NC], [1, NC]
    nc = wc.shape[1]
    d = w_enc.shape[0]

    # Compose in f32, then cast the streamed weight to bf16.
    w_total = w_enc @ wc                                       # [D, NC] f32
    b_total = b_enc @ wc + bc                                  # [1, NC] f32

    d_pad = _round_up(d, _LANE)
    w_p = (jnp.zeros((d_pad, _LANE), jnp.bfloat16)
           .at[:d, :nc].set(w_total.astype(jnp.bfloat16)))
    b_p = jnp.zeros((1, _LANE), jnp.float32).at[:, :nc].set(b_total)
    return {"w": w_p, "b": b_p, "d": d, "nc": nc}


# --------------------------------------------------------------------------
# Forward wrapper.
# --------------------------------------------------------------------------
def semi_supervised_forward(x_nchw, prepared, *, tm_target=512, tk_target=2048):
    w_p, b_p = prepared["w"], prepared["b"]
    d, nc = prepared["d"], prepared["nc"]
    d_pad = w_p.shape[0]

    b = x_nchw.shape[0]
    x_flat = x_nchw.reshape(b, -1).astype(jnp.bfloat16)        # direct bf16 cast
    assert x_flat.shape[1] == d, (x_flat.shape, d)

    # ---- row (M) tiling: multiples of 16 (bf16 sublane packing) ----
    b_pad = _round_up(max(b, 16), 16)
    target_m = tm_target
    if b_pad >= 32:
        # guarantee >= 2 M blocks so v7x's two TensorCores both get work
        target_m = min(target_m, b_pad // 2)
    tm = _pick_tile(b_pad, target_m, 16)

    # ---- K tiling: keep W resident (single pass) when it fits VMEM ----
    def vmem_est(tk):
        x_db = 2 * tm * tk * 2          # bf16 x, double-buffered
        w_db = 2 * tk * _LANE * 2       # bf16 W, double-buffered
        o_db = 2 * tm * _LANE * 4       # f32 resident output
        return x_db + w_db + o_db + 2 * _LANE * 4

    vmem_budget = 20 * 1024 * 1024      # comfortably under v7x's 32 MiB scoped
    if vmem_est(d_pad) <= vmem_budget:
        tk = d_pad                      # W streamed exactly once, resident over m
    else:
        tk = _pick_tile(d_pad, tk_target, _LANE)

    # ---- pad x only on the ragged edges (no full zero-slab rebuild) ----
    pad_rows = b_pad - b
    pad_cols = d_pad - d
    if pad_rows or pad_cols:
        x_p = jnp.pad(x_flat, ((0, pad_rows), (0, pad_cols)))
    else:
        x_p = x_flat

    grid = (b_pad // tm, d_pad // tk)

    out_padded = pl.pallas_call(
        _semisup_kernel,
        out_shape=jax.ShapeDtypeStruct((b_pad, _LANE), jnp.float32),
        grid_spec=pltpu.PrefetchScalarGridSpec(
            num_scalar_prefetch=0,
            grid=grid,
            in_specs=[
                pl.BlockSpec((tm, tk), lambda m, k: (m, k)),     # x
                pl.BlockSpec((tk, _LANE), lambda m, k: (k, 0)),  # W_total
                pl.BlockSpec((1, _LANE), lambda m, k: (0, 0)),   # b_total
            ],
            out_specs=pl.BlockSpec((tm, _LANE), lambda m, k: (m, 0)),
        ),
        compiler_params=pltpu.CompilerParams(
            dimension_semantics=("parallel", "arbitrary"),
            vmem_limit_bytes=32 * 1024 * 1024,
        ),
    )(x_p, w_p, b_p)

    # Strip row padding and lane padding of the logits.
    return out_padded[:b, :nc]


# --------------------------------------------------------------------------
# Parameter init + references.
# --------------------------------------------------------------------------
def init_params(key, in_dim, num_clusters=10):
    """Deterministic parameter init (mimics nn.Linear uniform init ranges)."""
    ks = jax.random.split(key, 6)
    lim_enc = 1.0 / jnp.sqrt(in_dim)
    lim_cls = 1.0 / jnp.sqrt(64.0)
    return {
        "w_time": jax.random.uniform(ks[0], (in_dim, 64), jnp.float32,
                                     -lim_enc, lim_enc),
        "b_time": jax.random.uniform(ks[1], (1, 64), jnp.float32,
                                     -lim_enc, lim_enc),
        "w_freq": jax.random.uniform(ks[2], (in_dim, 64), jnp.float32,
                                     -lim_enc, lim_enc),
        "b_freq": jax.random.uniform(ks[3], (1, 64), jnp.float32,
                                     -lim_enc, lim_enc),
        "w_cls": jax.random.uniform(ks[4], (64, num_clusters), jnp.float32,
                                    -lim_cls, lim_cls),
        "b_cls": jax.random.uniform(ks[5], (1, num_clusters), jnp.float32,
                                    -lim_cls, lim_cls),
    }


def _reference_f32(x_nchw, params):
    """Original module semantics in plain f32 JAX (two branches, avg, cls)."""
    b = x_nchw.shape[0]
    x = x_nchw.reshape(b, -1).astype(jnp.float32)
    ft = x @ params["w_time"] + params["b_time"]
    ff = x @ params["w_freq"] + params["b_freq"]
    feats = (ft + ff) / 2.0
    return feats @ params["w_cls"] + params["b_cls"]


def _reference_folded_bf16(x_nchw, params):
    """Reference mirroring the kernel's fold + bf16 casts (f32 accumulate)."""
    b = x_nchw.shape[0]
    x = x_nchw.reshape(b, -1).astype(jnp.bfloat16).astype(jnp.float32)
    w_enc = 0.5 * (params["w_time"] + params["w_freq"])
    b_enc = 0.5 * (params["b_time"] + params["b_freq"])
    w_total = (w_enc @ params["w_cls"]).astype(jnp.bfloat16).astype(jnp.float32)
    b_total = b_enc @ params["w_cls"] + params["b_cls"]
    return x @ w_total + b_total


if __name__ == "__main__":
    key = jax.random.PRNGKey(0)
    k_x, k_p = jax.random.split(key)

    # Small shapes: batch=2, channels=4, spatial=16x16 -> D = 4*16*16 = 1024
    B, C, H, W = 2, 4, 16, 16
    NUM_CLUSTERS = 10

    x = jax.random.normal(k_x, (B, C, H, W), dtype=jnp.float32)
    params = init_params(k_p, C * H * W, NUM_CLUSTERS)

    prepared = prepare_params(params)        # one-time weight fold / pad / cast
    out = jax.block_until_ready(semi_supervised_forward(x, prepared))
    assert out.shape == (B, NUM_CLUSTERS), out.shape

    ref_match = _reference_folded_bf16(x, params)
    ref_exact = _reference_f32(x, params)
    assert jnp.allclose(out, ref_match, atol=1e-3, rtol=1e-3), \
        "mismatch vs bf16-folded reference"
    assert jnp.allclose(out, ref_exact, atol=3e-2, rtol=3e-2), \
        "mismatch vs f32 module reference"

    print("KERNEL_OK")
</pallas_src>

<mosaic_0001>
module attributes {stable_mosaic.version = 11 : i64} {
  func.func @_semisup_kernel(%arg0: i32, %arg1: i32, %arg2: memref<16x1024xbf16, #tpu.memory_space<vmem>>, %arg3: memref<1024x128xbf16, #tpu.memory_space<vmem>>, %arg4: memref<1x128xf32, #tpu.memory_space<vmem>>, %arg5: memref<16x128xf32, #tpu.memory_space<vmem>>) attributes {dimension_semantics = [#tpu.dimension_semantics<parallel>, #tpu.dimension_semantics<arbitrary>], iteration_bounds = array<i64: 1, 1>, scalar_prefetch = 0 : i64, scratch_operands = 0 : i64, tpu.core_type = #tpu.core_type<tc>, window_params = [{transform_indices = @transform_0, window_bounds = array<i64: 16, 1024>}, {transform_indices = @transform_1, window_bounds = array<i64: 1024, 128>}, {pipeline_mode = #tpu.pipeline_mode<synchronous>, transform_indices = @transform_2, window_bounds = array<i64: 1, 128>}, {transform_indices = @transform_3, window_bounds = array<i64: 16, 128>}]} {
    %c0_i32 = arith.constant 0 : i32
    %0 = arith.cmpi eq, %arg1, %c0_i32 : i32
    %1 = arith.extui %0 : i1 to i32
    %c0_i32_0 = arith.constant 0 : i32
    %2 = arith.cmpi ne, %1, %c0_i32_0 : i32
    scf.if %2 {
      %c0_8 = arith.constant 0 : index
      %c0_9 = arith.constant 0 : index
      %9 = vector.load %arg4[%c0_8, %c0_9] : memref<1x128xf32, #tpu.memory_space<vmem>>, vector<1x128xf32>
      %10 = vector.shape_cast %9 : vector<1x128xf32> to vector<1x128xf32>
      %11 = vector.broadcast %10 : vector<1x128xf32> to vector<16x128xf32>
      %c0_10 = arith.constant 0 : index
      %c0_11 = arith.constant 0 : index
      %12 = vector.load %arg5[%c0_10, %c0_11] : memref<16x128xf32, #tpu.memory_space<vmem>>, vector<16x128xf32>
      tpu.vector_store %arg5[%c0_10, %c0_11], %11 {strides = array<i32>} : memref<16x128xf32, #tpu.memory_space<vmem>>, vector<16x128xf32>,
    } else {
    }
    %c0 = arith.constant 0 : index
    %c0_1 = arith.constant 0 : index
    %3 = vector.load %arg5[%c0, %c0_1] : memref<16x128xf32, #tpu.memory_space<vmem>>, vector<16x128xf32>
    %c0_2 = arith.constant 0 : index
    %c0_3 = arith.constant 0 : index
    %4 = vector.load %arg2[%c0_2, %c0_3] : memref<16x1024xbf16, #tpu.memory_space<vmem>>, vector<16x1024xbf16>
    %c0_4 = arith.constant 0 : index
    %c0_5 = arith.constant 0 : index
    %5 = vector.load %arg3[%c0_4, %c0_5] : memref<1024x128xbf16, #tpu.memory_space<vmem>>, vector<1024x128xbf16>
    %cst = arith.constant dense<0.000000e+00> : vector<16x128xf32>
    %6 = tpu.matmul %4, %5, %cst {dimension_numbers = #tpu.dot_dimension_numbers<[1], [0], [0], [1], [0, 0, 1, 1], [], []>} : vector<16x1024xbf16>, vector<1024x128xbf16>, vector<16x128xf32> -> vector<16x128xf32>
    %7 = arith.addf %3, %6 : vector<16x128xf32>
    %c0_6 = arith.constant 0 : index
    %c0_7 = arith.constant 0 : index
    %8 = vector.load %arg5[%c0_6, %c0_7] : memref<16x128xf32, #tpu.memory_space<vmem>>, vector<16x128xf32>
    tpu.vector_store %arg5[%c0_6, %c0_7], %7 {strides = array<i32>} : memref<16x128xf32, #tpu.memory_space<vmem>>, vector<16x128xf32>,
    return
  }
  func.func @transform_0(%arg0: i32, %arg1: i32) -> (i32, i32) {
    %c0_i32 = arith.constant 0 : i32
    return %arg0, %arg1 : i32, i32
  }
  func.func @transform_1(%arg0: i32, %arg1: i32) -> (i32, i32) {
    %c0_i32 = arith.constant 0 : i32
    %c0_i32_0 = arith.constant 0 : i32
    return %arg1, %c0_i32 : i32, i32
  }
  func.func @transform_2(%arg0: i32, %arg1: i32) -> (i32, i32) {
    %c0_i32 = arith.constant 0 : i32
    %c0_i32_0 = arith.constant 0 : i32
    %c0_i32_1 = arith.constant 0 : i32
    return %c0_i32, %c0_i32_0 : i32, i32
  }
  func.func @transform_3(%arg0: i32, %arg1: i32) -> (i32, i32) {
    %c0_i32 = arith.constant 0 : i32
    %c0_i32_0 = arith.constant 0 : i32
    return %arg0, %c0_i32 : i32, i32
  }
}

</mosaic_0001>

<bundles_post_ra>
// kernel: tpu_custom_call.1
= control target key start
LH: loop header
LB: loop body
LE: loop exit
PB: predicated region body
PF: predicated region fallthrough
CT: control target
= control target key end

     0   :  { %8 = vsyncpa [#allocation3], 0  ;;  %s1179_s0 = inlined_call_operand.hbm [shape: bf16[16,1024], index: 0, kind: input, shape index: {}]   ;;  %s1180_s1 = inlined_call_operand.hbm [shape: bf16[1024,128], index: 1, kind: input, shape index: {}]   ;;  %s1181_s2 = inlined_call_operand.vmem [shape: f32[1,128], index: 2, kind: input, shape index: {}]   ;;  %s1182_s3 = inlined_call_operand.hbm [shape: f32[16,128], index: 3, kind: output, shape index: {}]  }
   0x1   :  { %9 = vsyncpa [#allocation6], 0 }
   0x2   :  { %10 = vsyncpa [#allocation4], 0  ;;  %s1111_s12 = smov [#allocation2]   ;;  %s1039_s16 = scalar_lea.hbm %s1179_s0, 1024 }
   0x3   :  { %s16_s13 = sshll.u32 %s1111_s12, 4  ;;  %p1040_p0 = scmp.ne.s32.totalorder %s1179_s0, %s1039_s16  ;;  %s17_s13 = int_to_ptr.vmem [resolvable:$true] %s16_s13 }
   0x4   :  { %p1043_p1 = scmp.lt.u32.totalorder %s1039_s16, %s1179_s0 }
   0x6   :  { %p1045_p2 = pnand %p1043_p1, %p1040_p0 }
   0x8   :  { %1048 = shalt.err (!%p1045_p2)
}
   0x9   :  { %s1049_s21 = scalar_lea.vmem %s17_s13, 1024  ;;  %p1054_p4 = scmp.lt.s32.totalorder %s17_s13, %s17_s13 }
   0xa   :  { %p1050_p3 = scmp.ne.s32.totalorder %s17_s13, %s1049_s21  ;;  %p1055_p5 = scmp.lt.s32.totalorder %s1049_s21, %s1049_s21 }
   0xc   :  { %p1056_p6 = por %p1055_p5, %p1054_p4 }
   0xe   :  { %p1057_p7 = pnand %p1056_p6, %p1050_p3 }
  0x10   :  { %1060 = shalt.err (!%p1057_p7)
}
  0x11   :  { %s1112_s22 = smov 512   ;;  %s1113_s23 = smov 32  }
  0x12   :  { %22 = dma.hbm_to_vmem [thread:$0]  %s1179_s0, 1024, %s17_s13, [#allocation3], %s1112_s22, %s1112_s22, %s1113_s23  }
  0x13   :  { %s1114_s26 = smov [#allocation5]   ;;  %s1061_s30 = scalar_lea.hbm %s1180_s1, 8192 }
  0x14   :  { %s28_s27 = sshll.u32 %s1114_s26, 4  ;;  %p1062_p8 = scmp.ne.s32.totalorder %s1180_s1, %s1061_s30  ;;  %s29_s27 = int_to_ptr.vmem [resolvable:$true] %s28_s27 }
  0x15   :  { %p1065_p9 = scmp.lt.u32.totalorder %s1061_s30, %s1180_s1 }
  0x17   :  { %p1067_p10 = pnand %p1065_p9, %p1062_p8 }
  0x19   :  { %1070 = shalt.err (!%p1067_p10)
}
  0x1a   :  { %s1071_s8 = scalar_lea.vmem %s29_s27, 8192  ;;  %p1076_p12 = scmp.lt.s32.totalorder %s29_s27, %s29_s27 }
  0x1b   :  { %p1072_p11 = scmp.ne.s32.totalorder %s29_s27, %s1071_s8  ;;  %p1077_p13 = scmp.lt.s32.totalorder %s1071_s8, %s1071_s8 }
  0x1d   :  { %p1078_p0 = por %p1077_p13, %p1076_p12 }
  0x1f   :  { %p1079_p1 = pnand %p1078_p0, %p1072_p11 }
  0x21   :  { %1082 = shalt.err (!%p1079_p1)
}
  0x22   :  { %s1115_s0 = smov 64   ;;  %s1116_s9 = smov 4  }
  0x23   :  { %34 = dma.hbm_to_vmem [thread:$0]  %s1180_s1, 8192, %s29_s27, [#allocation6], %s1115_s0, %s1115_s0, %s1116_s9  }
  0x24   :  { %1105 = dma.done.wait [#allocation3], 1024  }
  0x25   :  { %1106 = vsyncadd [#allocation3], 4294966272 }
  0x26   :  { %1107 = dma.done.wait [#allocation6], 8192  }
  0x27   :  { %1108 = vsyncadd [#allocation6], 4294959104  ;;  %v975_v0 = vld [vmem:[#allocation5 + $0x40] sm:$0xff]   ;;  %v979_v4 = vld [vmem:[#allocation5 + $0x48] sm:$0xff]   ;;  %s1117_s13 = smov [#allocation7]  }
  0x28   :  { %v976_v1 = vld [vmem:[#allocation5 + $0xc0] sm:$0xff]   ;;  %878 = vmatprep.subr.bf16.mxu0 %v975_v0  ;;  %v980_v5 = vld [vmem:[#allocation5 + $0xc8] sm:$0xff]   ;;  %v983_v8 = vld [vmem:[#allocation5 + $0x50] sm:$0xff]   ;;  %s792_s14 = sshll.u32 %s1117_s13, 4  ;;  %s793_s14 = int_to_ptr.vmem [resolvable:$true] %s792_s14 }
  0x29   :  { %v977_v2 = vld [vmem:[#allocation5] sm:$0xff]   ;;  %900 = vmatprep.subr.bf16.mxu1 %v976_v1  ;;  %v981_v6 = vld [vmem:[#allocation5 + $0x8] sm:$0xff]   ;;  %v984_v9 = vld [vmem:[#allocation5 + $0xd0] sm:$0xff]   ;;  %s1083_s15 = scalar_lea.vmem %s793_s14, 256  ;;  %p1088_p3 = scmp.lt.s32.totalorder %s793_s14, %s793_s14 }
  0x2a   :  { %v978_v3 = vld [vmem:[#allocation5 + $0x80] sm:$0xff]   ;;  %879 = vmatpush3.bf16.msra.mxu0 %v977_v2  ;;  %v982_v7 = vld [vmem:[#allocation5 + $0x88] sm:$0xff]   ;;  %v985_v10 = vld [vmem:[#allocation5 + $0x10] sm:$0xff]   ;;  %p1084_p2 = scmp.ne.s32.totalorder %s793_s14, %s1083_s15  ;;  %p1089_p4 = scmp.lt.s32.totalorder %s1083_s15, %s1083_s15 }
  0x2b   :  { %901 = vmatpush3.bf16.msra.mxu1 %v978_v3  ;;  %880 = vmatprep.subr.bf16.mxu0 %v979_v4  ;;  %v986_v11 = vld [vmem:[#allocation5 + $0x90] sm:$0xff]   ;;  %v987_v12 = vld [vmem:[#allocation5 + $0x58] sm:$0xff]   ;;  %v991_v16 = vld [vmem:[#allocation5 + $0x60] sm:$0xff]  }
  0x2c   :  { %902 = vmatprep.subr.bf16.mxu1 %v980_v5  ;;  %v988_v13 = vld [vmem:[#allocation5 + $0xd8] sm:$0xff]   ;;  %v992_v17 = vld [vmem:[#allocation5 + $0xe0] sm:$0xff]   ;;  %v995_v20 = vld [vmem:[#allocation5 + $0x68] sm:$0xff]   ;;  %p1090_p5 = por %p1089_p4, %p1088_p3 }
  0x2d   :  { %v989_v14 = vld [vmem:[#allocation5 + $0x18] sm:$0xff]   ;;  %v993_v18 = vld [vmem:[#allocation5 + $0x20] sm:$0xff]   ;;  %v996_v21 = vld [vmem:[#allocation5 + $0xe8] sm:$0xff]  }
  0x2e   :  { %881 = vmatpush3.bf16.msra.mxu0 %v981_v6  ;;  %v990_v15 = vld [vmem:[#allocation5 + $0x98] sm:$0xff]   ;;  %v994_v19 = vld [vmem:[#allocation5 + $0xa0] sm:$0xff]   ;;  %v997_v22 = vld [vmem:[#allocation5 + $0x28] sm:$0xff]   ;;  %p1091_p6 = pnand %p1090_p5, %p1084_p2 }
  0x2f   :  { %903 = vmatpush3.bf16.msra.mxu1 %v982_v7  ;;  %882 = vmatprep.subr.bf16.mxu0 %v983_v8  ;;  %v998_v23 = vld [vmem:[#allocation5 + $0xa8] sm:$0xff]   ;;  %v999_v24 = vld [vmem:[#allocation5 + $0x70] sm:$0xff]   ;;  %v1003_v28 = vld [vmem:[#allocation5 + $0x78] sm:$0xff]  }
  0x30   :  { %904 = vmatprep.subr.bf16.mxu1 %v984_v9  ;;  %v1000_v25 = vld [vmem:[#allocation5 + $0xf0] sm:$0xff]   ;;  %v1004_v29 = vld [vmem:[#allocation5 + $0xf8] sm:$0xff]   ;;  %v59_v32 = vld [vmem:[#allocation2] sm:$0xff] }
  0x31   :  { %v1001_v26 = vld [vmem:[#allocation5 + $0x30] sm:$0xff]   ;;  %v1005_v30 = vld [vmem:[#allocation5 + $0x38] sm:$0xff]   ;;  %v63_v33 = vld [vmem:[#allocation2 + $0x20] sm:$0xff] }
  0x32   :  { %883 = vmatpush3.bf16.msra.mxu0 %v985_v10  ;;  %v1002_v27 = vld [vmem:[#allocation5 + $0xb0] sm:$0xff]   ;;  %v1006_v31 = vld [vmem:[#allocation5 + $0xb8] sm:$0xff]   ;;  %v60_v34 = vld [vmem:[#allocation2 + $0x8] sm:$0xff]  ;;  %v806_v35 = vcombine.low %v59_v32, %v63_v33  ;;  %v807_v36 = vcombine.high %v59_v32, %v63_v33 }
  0x33   :  { %905 = vmatpush3.bf16.msra.mxu1 %v986_v11  ;;  %884 = vmatprep.subr.bf16.mxu0 %v987_v12  ;;  %v64_v37 = vld [vmem:[#allocation2 + $0x28] sm:$0xff]  ;;  %v1007_v40 = vld [vmem:[#allocation5 + $0x140] sm:$0xff]   ;;  %v1015_v48 = vld [vmem:[#allocation5 + $0x150] sm:$0xff]  }
  0x34   :  { %906 = vmatprep.subr.bf16.mxu1 %v988_v13  ;;  %v808_v38 = vcombine.low %v60_v34, %v64_v37  ;;  %v809_v39 = vcombine.high %v60_v34, %v64_v37  ;;  %651 = vmatprep.mubr.bf16.mxu0 %v807_v36  ;;  %v1008_v41 = vld [vmem:[#allocation5 + $0x1c0] sm:$0xff]   ;;  %v1011_v44 = vld [vmem:[#allocation5 + $0x148] sm:$0xff]   ;;  %v1016_v49 = vld [vmem:[#allocation5 + $0x1d0] sm:$0xff]  }
  0x35   :  { %v1009_v42 = vld [vmem:[#allocation5 + $0x100] sm:$0xff]   ;;  %v1012_v45 = vld [vmem:[#allocation5 + $0x1c8] sm:$0xff]   ;;  %v1017_v50 = vld [vmem:[#allocation5 + $0x110] sm:$0xff]  }
  0x36   :  { %885 = vmatpush3.bf16.msra.mxu0 %v989_v14  ;;  %692 = vmatprep.mubr.bf16.mxu1 %v809_v39  ;;  %v1010_v43 = vld [vmem:[#allocation5 + $0x180] sm:$0xff]   ;;  %v1013_v46 = vld [vmem:[#allocation5 + $0x108] sm:$0xff]   ;;  %v1018_v51 = vld [vmem:[#allocation5 + $0x190] sm:$0xff]  }
  0x37   :  { %907 = vmatpush3.bf16.msra.mxu1 %v990_v15  ;;  %886 = vmatprep.subr.bf16.mxu0 %v991_v16  ;;  %v1014_v47 = vld [vmem:[#allocation5 + $0x188] sm:$0xff]   ;;  %v1019_v52 = vld [vmem:[#allocation5 + $0x158] sm:$0xff]   ;;  %v1023_v56 = vld [vmem:[#allocation5 + $0x160] sm:$0xff]  }
  0x38   :  { %908 = vmatprep.subr.bf16.mxu1 %v992_v17  ;;  %v1020_v53 = vld [vmem:[#allocation5 + $0x1d8] sm:$0xff]   ;;  %v1024_v57 = vld [vmem:[#allocation5 + $0x1e0] sm:$0xff]   ;;  %v1027_v60 = vld [vmem:[#allocation5 + $0x168] sm:$0xff]  }
  0x39   :  { %v1021_v54 = vld [vmem:[#allocation5 + $0x118] sm:$0xff]   ;;  %v1025_v58 = vld [vmem:[#allocation5 + $0x120] sm:$0xff]   ;;  %v1028_v61 = vld [vmem:[#allocation5 + $0x1e8] sm:$0xff]  }
  0x3a   :  { %887 = vmatpush3.bf16.msra.mxu0 %v993_v18  ;;  %v1022_v55 = vld [vmem:[#allocation5 + $0x198] sm:$0xff]   ;;  %v1026_v59 = vld [vmem:[#allocation5 + $0x1a0] sm:$0xff]   ;;  %v1029_v62 = vld [vmem:[#allocation5 + $0x128] sm:$0xff]  }
  0x3b   :  { %909 = vmatpush3.bf16.msra.mxu1 %v994_v19  ;;  %888 = vmatprep.subr.bf16.mxu0 %v995_v20  ;;  %v1030_v63 = vld [vmem:[#allocation5 + $0x1a8] sm:$0xff]   ;;  %v1031_v0 = vld [vmem:[#allocation5 + $0x170] sm:$0xff]   ;;  %v1035_v4 = vld [vmem:[#allocation5 + $0x178] sm:$0xff]  }
  0x3c   :  { %910 = vmatprep.subr.bf16.mxu1 %v996_v21  ;;  %v1032_v1 = vld [vmem:[#allocation5 + $0x1f0] sm:$0xff]   ;;  %v1036_v5 = vld [vmem:[#allocation5 + $0x1f8] sm:$0xff]  }
  0x3d   :  { %v1033_v2 = vld [vmem:[#allocation5 + $0x130] sm:$0xff]   ;;  %v1037_v6 = vld [vmem:[#allocation5 + $0x138] sm:$0xff]  }
  0x3e   :  { %889 = vmatpush3.bf16.msra.mxu0 %v997_v22  ;;  %v1034_v3 = vld [vmem:[#allocation5 + $0x1b0] sm:$0xff]   ;;  %v1038_v7 = vld [vmem:[#allocation5 + $0x1b8] sm:$0xff]  }
  0x3f   :  { %911 = vmatpush3.bf16.msra.mxu1 %v998_v23  ;;  %890 = vmatprep.subr.bf16.mxu0 %v999_v24  ;;  %v61_v8 = vld [vmem:[#allocation2 + $0x10] sm:$0xff]  ;;  %v62_v12 = vld [vmem:[#allocation2 + $0x18] sm:$0xff] }
  0x40   :  { %912 = vmatprep.subr.bf16.mxu1 %v1000_v25  ;;  %v65_v9 = vld [vmem:[#allocation2 + $0x30] sm:$0xff]  ;;  %v66_v13 = vld [vmem:[#allocation2 + $0x38] sm:$0xff] }
  0x41   :  { %v810_v10 = vcombine.low %v61_v8, %v65_v9  ;;  %v811_v11 = vcombine.high %v61_v8, %v65_v9  ;;  %v812_v14 = vcombine.low %v62_v12, %v66_v13  ;;  %v813_v15 = vcombine.high %v62_v12, %v66_v13 }
  0x42   :  { %891 = vmatpush3.bf16.msra.mxu0 %v1001_v26 }
  0x43   :  { %913 = vmatpush3.bf16.msra.mxu1 %v1002_v27  ;;  %892 = vmatprep.subr.bf16.mxu0 %v1003_v28 }
  0x44   :  { %914 = vmatprep.subr.bf16.mxu1 %v1004_v29 }
  0x46   :  { %893 = vmatpush3.bf16.msra.mxu0 %v1005_v30 }
  0x47   :  { %915 = vmatpush3.bf16.msra.mxu1 %v1006_v31  ;;  %922 = vmatprep.subr.bf16.mxu0 %v1007_v40 }
  0x48   :  { %944 = vmatprep.subr.bf16.mxu1 %v1008_v41 }
  0x49   :  { %652 = vmatmul.mubr.bf16.vlgmr.msra.gmra.mrb[0].mxu0 %v806_v35 }
  0x4a   :  { %693 = vmatmul.mubr.bf16.vlgmr.msra.gmra.mrb[0].mxu1 %v808_v38  ;;  %923 = vmatpush3.bf16.msra.mxu0 %v1009_v42  ;;  %v805_v42 = vld [vmem:[%s1181_s2] ss:$0 sm:$0xff] }
  0x4b   :  { %945 = vmatpush3.bf16.msra.mxu1 %v1010_v43  ;;  %924 = vmatprep.subr.bf16.mxu0 %v1011_v44 }
  0x4c   :  { %946 = vmatprep.subr.bf16.mxu1 %v1012_v45  ;;  %733 = vmatprep.mubr.bf16.mxu0 %v811_v11 }
  0x4d   :  { %774 = vmatprep.mubr.bf16.mxu1 %v813_v15 }
  0x4e   :  { %925 = vmatpush3.bf16.msra.mxu0 %v1013_v46 }
  0x4f   :  { %947 = vmatpush3.bf16.msra.mxu1 %v1014_v47  ;;  %926 = vmatprep.subr.bf16.mxu0 %v1015_v48 }
  0x50   :  { %948 = vmatprep.subr.bf16.mxu1 %v1016_v49 }
  0x52   :  { %927 = vmatpush3.bf16.msra.mxu0 %v1017_v50 }
  0x53   :  { %949 = vmatpush3.bf16.msra.mxu1 %v1018_v51  ;;  %928 = vmatprep.subr.bf16.mxu0 %v1019_v52 }
  0x54   :  { %950 = vmatprep.subr.bf16.mxu1 %v1020_v53 }
  0x56   :  { %929 = vmatpush3.bf16.msra.mxu0 %v1021_v54 }
  0x57   :  { %951 = vmatpush3.bf16.msra.mxu1 %v1022_v55  ;;  %930 = vmatprep.subr.bf16.mxu0 %v1023_v56 }
  0x58   :  { %952 = vmatprep.subr.bf16.mxu1 %v1024_v57 }
  0x5a   :  { %931 = vmatpush3.bf16.msra.mxu0 %v1025_v58 }
  0x5b   :  { %953 = vmatpush3.bf16.msra.mxu1 %v1026_v59  ;;  %932 = vmatprep.subr.bf16.mxu0 %v1027_v60 }
  0x5c   :  { %954 = vmatprep.subr.bf16.mxu1 %v1028_v61 }
  0x5e   :  { %933 = vmatpush3.bf16.msra.mxu0 %v1029_v62 }
  0x5f   :  { %955 = vmatpush3.bf16.msra.mxu1 %v1030_v63  ;;  %934 = vmatprep.subr.bf16.mxu0 %v1031_v0 }
  0x60   :  { %956 = vmatprep.subr.bf16.mxu1 %v1032_v1 }
  0x62   :  { %935 = vmatpush3.bf16.msra.mxu0 %v1033_v2 }
  0x63   :  { %957 = vmatpush3.bf16.msra.mxu1 %v1034_v3  ;;  %936 = vmatprep.subr.bf16.mxu0 %v1035_v4 }
  0x64   :  { %958 = vmatprep.subr.bf16.mxu1 %v1036_v5 }
  0x66   :  { %937 = vmatpush3.bf16.msra.mxu0 %v1037_v6 }
  0x67   :  { %959 = vmatpush3.bf16.msra.mxu1 %v1038_v7 }
  0x69   :  { %734 = vmatmul.mubr.bf16.vlgmr.msra.gmra.mrb[4].mxu0 %v810_v10 }
  0x6a   :  { %775 = vmatmul.mubr.bf16.vlgmr.msra.gmra.mrb[4].mxu1 %v812_v14 }
 0x11c   :  { %v894_v16 = vpop.f32.mrb[0].mxu0 }
 0x11d   :  { %v916_v17 = vpop.f32.mrb[0].mxu1  ;;  %v895_v18 = vpop.f32.mrb[1].mxu0 }
 0x11e   :  { %v896_v19 = vadd.f32 %v895_v18, %v894_v16  ;;  %v917_v20 = vpop.f32.mrb[1].mxu1  ;;  %v897_v21 = vpop.f32.mrb[2].mxu0 }
 0x11f   :  { %v918_v22 = vadd.f32 %v917_v20, %v916_v17  ;;  %v919_v23 = vpop.f32.mrb[2].mxu1  ;;  %v898_v24 = vpop.f32.mrb[3].mxu0 }
 0x120   :  { %v899_v25 = vadd.f32 %v898_v24, %v897_v21  ;;  %v920_v26 = vpop.f32.mrb[3].mxu1 }
 0x121   :  { %v695_v27 = vadd.f32 %v918_v22, %v896_v19  ;;  %v921_v28 = vadd.f32 %v920_v26, %v919_v23 }
 0x123   :  { %v698_v29 = vadd.f32 %v921_v28, %v899_v25 }
 0x13c   :  { %v938_v30 = vpop.f32.mrb[4].mxu0 }
 0x13d   :  { %v960_v31 = vpop.f32.mrb[4].mxu1  ;;  %v939_v32 = vpop.f32.mrb[5].mxu0 }
 0x13e   :  { %v940_v33 = vadd.f32 %v939_v32, %v938_v30  ;;  %v961_v34 = vpop.f32.mrb[5].mxu1  ;;  %v941_v35 = vpop.f32.mrb[6].mxu0 }
 0x13f   :  { %v962_v36 = vadd.f32 %v961_v34, %v960_v31  ;;  %v963_v37 = vpop.f32.mrb[6].mxu1  ;;  %v942_v38 = vpop.f32.mrb[7].mxu0 }
 0x140   :  { %v736_v39 = vadd.f32 %v940_v33, %v695_v27  ;;  %v943_v40 = vadd.f32 %v942_v38, %v941_v35  ;;  %v964_v41 = vpop.f32.mrb[7].mxu1 }
 0x141   :  { %v965_v43 = vadd.f32 %v964_v41, %v963_v37 }
 0x142   :  { %v777_v44 = vadd.f32 %v962_v36, %v736_v39  ;;  %v739_v45 = vadd.f32 %v943_v40, %v698_v29 }
 0x144   :  { %v783_v46 = vadd.f32 %v805_v42, %v777_v44  ;;  %v780_v47 = vadd.f32 %v965_v43, %v739_v45 }
 0x146   :  { %785 = vst [vmem:[#allocation7] sm:$0xff] %v783_v46  ;;  %v784_v48 = vadd.f32 %v805_v42, %v780_v47 }
 0x148   :  { %786 = vst [vmem:[#allocation7 + $0x8] sm:$0xff] %v784_v48 }
 0x149   :  { %1094 = shalt.err (!%p1091_p6)
}
 0x14a   :  { %s1095_s17 = scalar_lea.hbm %s1182_s3, 256 }
 0x14b   :  { %p1096_p7 = scmp.ne.s32.totalorder %s1182_s3, %s1095_s17  ;;  %p1099_p8 = scmp.lt.u32.totalorder %s1095_s17, %s1182_s3 }
 0x14d   :  { %p1101_p9 = pnand %p1099_p8, %p1096_p7 }
 0x14f   :  { %1104 = shalt.err (!%p1101_p9)
}
 0x150   :  { %s1118_s22 = smov 128   ;;  %s1119_s23 = smov 8  }
 0x151   :  { %798 = dma.vmem_to_hbm [thread:$0]  %s793_s14, 256, %s1182_s3, [#allocation4], %s1118_s22, %s1118_s22, %s1119_s23  }
 0x152   :  { %1109 = dma.done.wait [#allocation4], 256  }
 0x153   :  { %1110 = vsyncadd [#allocation4], 4294967040 }
 0x154   :  { %802 = vsyncpa [#allocation3], 1 }
 0x155   :  { %803 = vsyncpa [#allocation6], 1 }
 0x156   :  { %804 = vsyncpa [#allocation4], 1 }

</bundles_post_ra>
